<compile_context>
chip_gen: v6e
topology: v6e:2x2x1
jax: 0.10.0
libtpu: 0.0.40
codegen_flags: <defaults>
</compile_context>

<pallas_src>
import functools
import math

import jax
import jax.numpy as jnp
from jax.experimental import pallas as pl
from jax.experimental.pallas import tpu as pltpu


def _pow_static(x, gamma):
    """x ** gamma, using chained multiplies when gamma is a small integer."""
    g = float(gamma)
    gi = int(round(g))
    if abs(g - gi) < 1e-12 and 0 <= gi <= 16:
        if gi == 0:
            return jnp.ones_like(x)
        r = x
        for _ in range(gi - 1):
            r = r * x
        return r
    return x ** jnp.float32(g)  # fallback: non-integer gamma


def _focal_loss_kernel(pt_ref, tgt_ref, out_ref, *, alpha, gamma, epsilon, k, d):
    pt = pt_ref[...].astype(jnp.float32)   # (tm, k*d)
    t = tgt_ref[...].astype(jnp.float32)   # (tm, k*d)

    loss = None
    if alpha != 0.0:
        loss = (-alpha) * _pow_static(1.0 - pt, gamma) * t * jnp.log(pt + epsilon)
    if alpha != 1.0:
        neg = (-(1.0 - alpha)) * _pow_static(pt, gamma) * (1.0 - t) * jnp.log(
            1.0 - pt + epsilon)
        loss = neg if loss is None else loss + neg

    # Per-logical-row mean: each packed row holds k logical rows of width d in
    # contiguous lane segments; reduce each segment and emit a (tm, k) block.
    inv_d = 1.0 / float(d)
    cols = []
    for j in range(k):
        seg = loss[:, j * d:(j + 1) * d]
        cols.append(jnp.sum(seg, axis=-1, keepdims=True) * inv_d)
    out = cols[0] if k == 1 else jnp.concatenate(cols, axis=-1)
    out_ref[...] = out.astype(out_ref.dtype)


def focal_loss(pt, targets, alpha=1.0, gamma=2.0, *,
               target_block_bytes=2 * 1024 * 1024):
    """Pallas equivalent of FocalLoss.forward (alpha=1, gamma=2 by default)."""
    assert pt.shape == targets.shape
    orig_shape = pt.shape
    D = int(orig_shape[-1])
    lead = orig_shape[:-1]
    M = int(math.prod(lead)) if lead else 1

    pt2 = pt.reshape(M, D).astype(jnp.float32)
    tg2 = targets.reshape(M, D).astype(jnp.float32)

    # Lane packing factor: k logical rows of width D per 128-lane row.
    if 8 <= D < 128 and 128 % D == 0:
        k = 128 // D
    else:
        k = 1
    Dp = k * D

    Mp = -(-M // k)                        # packed rows before tile padding
    rows_needed = -(-Mp // 8) * 8          # round up to sublane multiple

    # Row tile sized for ~target_block_bytes per input block (multiple of 8).
    tm = max(8, (target_block_bytes // (4 * Dp)) // 8 * 8)
    if tm >= rows_needed:
        if rows_needed >= 16:
            # Keep >=2 grid steps so both v7x TensorCores get work.
            tm = -(-(rows_needed // 2) // 8) * 8
        else:
            tm = rows_needed
    grid_m = -(-Mp // tm)
    Mp_pad = grid_m * tm
    M_pad = Mp_pad * k

    # Pad rows (safe values: pt=0.5 keeps logs finite, targets=0); padded rows
    # are discarded after the kernel.
    if M_pad > M:
        pad = M_pad - M
        pt2 = jnp.pad(pt2, ((0, pad), (0, 0)), constant_values=0.5)
        tg2 = jnp.pad(tg2, ((0, pad), (0, 0)), constant_values=0.0)

    pt_packed = pt2.reshape(Mp_pad, Dp)
    tg_packed = tg2.reshape(Mp_pad, Dp)

    kernel = functools.partial(
        _focal_loss_kernel,
        alpha=float(alpha),
        gamma=float(gamma),
        epsilon=1e-6,
        k=k,
        d=D,
    )

    # VMEM budget: 2 inputs x 2 pipeline buffers + double-buffered output.
    in_block_bytes = tm * Dp * 4
    out_block_bytes = tm * k * 4
    vmem_needed = 4 * in_block_bytes + 2 * out_block_bytes + (2 << 20)
    vmem_limit = int(min(max(vmem_needed, 16 * 1024 * 1024), 48 * 1024 * 1024))

    out = pl.pallas_call(
        kernel,
        out_shape=jax.ShapeDtypeStruct((Mp_pad, k), jnp.float32),
        grid=(grid_m,),
        in_specs=[
            pl.BlockSpec((tm, Dp), lambda i: (i, 0)),
            pl.BlockSpec((tm, Dp), lambda i: (i, 0)),
        ],
        out_specs=pl.BlockSpec((tm, k), lambda i: (i, 0)),
        compiler_params=pltpu.CompilerParams(
            dimension_semantics=("parallel",),
            vmem_limit_bytes=vmem_limit,
        ),
    )(pt_packed, tg_packed)

    out_flat = out.reshape(Mp_pad * k)[:M]
    return out_flat.reshape(lead)


def focal_loss_ref(pt, targets, alpha=1.0, gamma=2.0):
    eps = 1e-6
    loss = (
        -alpha * (1.0 - pt) ** gamma * targets * jnp.log(pt + eps)
        - (1.0 - alpha) * pt ** gamma * (1.0 - targets) * jnp.log(1.0 - pt + eps)
    )
    return jnp.mean(loss, axis=-1)


if __name__ == "__main__":
    key = jax.random.PRNGKey(0)

    # Test 1: default FocalLoss(alpha=1, gamma=2), NCHW-like input (packed path).
    k1, k2 = jax.random.split(key)
    shape = (2, 4, 16, 16)
    pt = jax.random.uniform(k1, shape, jnp.float32, minval=0.01, maxval=0.99)
    tg = (jax.random.uniform(k2, shape) > 0.5).astype(jnp.float32)
    out = jax.block_until_ready(focal_loss(pt, tg, alpha=1.0, gamma=2.0))
    ref = focal_loss_ref(pt, tg, alpha=1.0, gamma=2.0)
    assert out.shape == ref.shape == (2, 4, 16)
    assert jnp.allclose(out, ref, atol=1e-5, rtol=1e-5)

    # Test 2: non-default alpha/gamma, awkward leading dims (exercises padding
    # and both loss branches).
    k3, k4 = jax.random.split(k1)
    shape2 = (3, 5, 7, 16)
    pt2 = jax.random.uniform(k3, shape2, jnp.float32, minval=0.01, maxval=0.99)
    tg2 = (jax.random.uniform(k4, shape2) > 0.5).astype(jnp.float32)
    out2 = jax.block_until_ready(focal_loss(pt2, tg2, alpha=0.25, gamma=3.0))
    ref2 = focal_loss_ref(pt2, tg2, alpha=0.25, gamma=3.0)
    assert out2.shape == ref2.shape == (3, 5, 7)
    assert jnp.allclose(out2, ref2, atol=1e-4, rtol=1e-4)

    # Test 3: wide last dim (no packing, k == 1 path).
    k5, k6 = jax.random.split(k3)
    shape3 = (4, 8, 256)
    pt3 = jax.random.uniform(k5, shape3, jnp.float32, minval=0.01, maxval=0.99)
    tg3 = (jax.random.uniform(k6, shape3) > 0.5).astype(jnp.float32)
    out3 = jax.block_until_ready(focal_loss(pt3, tg3, alpha=1.0, gamma=2.0))
    ref3 = focal_loss_ref(pt3, tg3, alpha=1.0, gamma=2.0)
    assert out3.shape == ref3.shape == (4, 8)
    assert jnp.allclose(out3, ref3, atol=1e-5, rtol=1e-5)

    print("KERNEL_OK")
</pallas_src>

<mosaic_0001>
module attributes {stable_mosaic.version = 11 : i64} {
  func.func @_focal_loss_kernel(%arg0: i32, %arg1: memref<8x128xf32, #tpu.memory_space<vmem>>, %arg2: memref<8x128xf32, #tpu.memory_space<vmem>>, %arg3: memref<8x8xf32, #tpu.memory_space<vmem>>) attributes {dimension_semantics = [#tpu.dimension_semantics<parallel>], iteration_bounds = array<i64: 2>, scalar_prefetch = 0 : i64, scratch_operands = 0 : i64, tpu.core_type = #tpu.core_type<tc>, window_params = [{transform_indices = @transform_0, window_bounds = array<i64: 8, 128>}, {transform_indices = @transform_1, window_bounds = array<i64: 8, 128>}, {transform_indices = @transform_2, window_bounds = array<i64: 8, 8>}]} {
    %c0 = arith.constant 0 : index
    %c0_0 = arith.constant 0 : index
    %0 = vector.load %arg1[%c0, %c0_0] : memref<8x128xf32, #tpu.memory_space<vmem>>, vector<8x128xf32>
    %c0_1 = arith.constant 0 : index
    %c0_2 = arith.constant 0 : index
    %1 = vector.load %arg2[%c0_1, %c0_2] : memref<8x128xf32, #tpu.memory_space<vmem>>, vector<8x128xf32>
    %cst = arith.constant 1.000000e+00 : f32
    %2 = vector.broadcast %cst : f32 to vector<8x128xf32>
    %3 = arith.subf %2, %0 : vector<8x128xf32>
    %4 = arith.mulf %3, %3 : vector<8x128xf32>
    %cst_3 = arith.constant -1.000000e+00 : f32
    %5 = vector.broadcast %cst_3 : f32 to vector<8x128xf32>
    %6 = arith.mulf %5, %4 : vector<8x128xf32>
    %7 = arith.mulf %6, %1 : vector<8x128xf32>
    %cst_4 = arith.constant 9.99999997E-7 : f32
    %8 = vector.broadcast %cst_4 : f32 to vector<8x128xf32>
    %9 = arith.addf %0, %8 : vector<8x128xf32>
    %10 = math.log %9 : vector<8x128xf32>
    %11 = arith.mulf %7, %10 : vector<8x128xf32>
    %12 = vector.extract_strided_slice %11 {offsets = [0, 0], sizes = [8, 16], strides = [1, 1]} : vector<8x128xf32> to vector<8x16xf32>
    %cst_5 = arith.constant dense<0.000000e+00> : vector<8xf32>
    %13 = vector.multi_reduction <add>, %12, %cst_5 [1] : vector<8x16xf32> to vector<8xf32>
    %14 = vector.shape_cast %13 : vector<8xf32> to vector<8x1xf32>
    %cst_6 = arith.constant 6.250000e-02 : f32
    %15 = vector.broadcast %cst_6 : f32 to vector<8x1xf32>
    %16 = arith.mulf %14, %15 : vector<8x1xf32>
    %17 = vector.extract_strided_slice %11 {offsets = [0, 16], sizes = [8, 16], strides = [1, 1]} : vector<8x128xf32> to vector<8x16xf32>
    %cst_7 = arith.constant dense<0.000000e+00> : vector<8xf32>
    %18 = vector.multi_reduction <add>, %17, %cst_7 [1] : vector<8x16xf32> to vector<8xf32>
    %19 = vector.shape_cast %18 : vector<8xf32> to vector<8x1xf32>
    %cst_8 = arith.constant 6.250000e-02 : f32
    %20 = vector.broadcast %cst_8 : f32 to vector<8x1xf32>
    %21 = arith.mulf %19, %20 : vector<8x1xf32>
    %22 = vector.extract_strided_slice %11 {offsets = [0, 32], sizes = [8, 16], strides = [1, 1]} : vector<8x128xf32> to vector<8x16xf32>
    %cst_9 = arith.constant dense<0.000000e+00> : vector<8xf32>
    %23 = vector.multi_reduction <add>, %22, %cst_9 [1] : vector<8x16xf32> to vector<8xf32>
    %24 = vector.shape_cast %23 : vector<8xf32> to vector<8x1xf32>
    %cst_10 = arith.constant 6.250000e-02 : f32
    %25 = vector.broadcast %cst_10 : f32 to vector<8x1xf32>
    %26 = arith.mulf %24, %25 : vector<8x1xf32>
    %27 = vector.extract_strided_slice %11 {offsets = [0, 48], sizes = [8, 16], strides = [1, 1]} : vector<8x128xf32> to vector<8x16xf32>
    %cst_11 = arith.constant dense<0.000000e+00> : vector<8xf32>
    %28 = vector.multi_reduction <add>, %27, %cst_11 [1] : vector<8x16xf32> to vector<8xf32>
    %29 = vector.shape_cast %28 : vector<8xf32> to vector<8x1xf32>
    %cst_12 = arith.constant 6.250000e-02 : f32
    %30 = vector.broadcast %cst_12 : f32 to vector<8x1xf32>
    %31 = arith.mulf %29, %30 : vector<8x1xf32>
    %32 = vector.extract_strided_slice %11 {offsets = [0, 64], sizes = [8, 16], strides = [1, 1]} : vector<8x128xf32> to vector<8x16xf32>
    %cst_13 = arith.constant dense<0.000000e+00> : vector<8xf32>
    %33 = vector.multi_reduction <add>, %32, %cst_13 [1] : vector<8x16xf32> to vector<8xf32>
    %34 = vector.shape_cast %33 : vector<8xf32> to vector<8x1xf32>
    %cst_14 = arith.constant 6.250000e-02 : f32
    %35 = vector.broadcast %cst_14 : f32 to vector<8x1xf32>
    %36 = arith.mulf %34, %35 : vector<8x1xf32>
    %37 = vector.extract_strided_slice %11 {offsets = [0, 80], sizes = [8, 16], strides = [1, 1]} : vector<8x128xf32> to vector<8x16xf32>
    %cst_15 = arith.constant dense<0.000000e+00> : vector<8xf32>
    %38 = vector.multi_reduction <add>, %37, %cst_15 [1] : vector<8x16xf32> to vector<8xf32>
    %39 = vector.shape_cast %38 : vector<8xf32> to vector<8x1xf32>
    %cst_16 = arith.constant 6.250000e-02 : f32
    %40 = vector.broadcast %cst_16 : f32 to vector<8x1xf32>
    %41 = arith.mulf %39, %40 : vector<8x1xf32>
    %42 = vector.extract_strided_slice %11 {offsets = [0, 96], sizes = [8, 16], strides = [1, 1]} : vector<8x128xf32> to vector<8x16xf32>
    %cst_17 = arith.constant dense<0.000000e+00> : vector<8xf32>
    %43 = vector.multi_reduction <add>, %42, %cst_17 [1] : vector<8x16xf32> to vector<8xf32>
    %44 = vector.shape_cast %43 : vector<8xf32> to vector<8x1xf32>
    %cst_18 = arith.constant 6.250000e-02 : f32
    %45 = vector.broadcast %cst_18 : f32 to vector<8x1xf32>
    %46 = arith.mulf %44, %45 : vector<8x1xf32>
    %47 = vector.extract_strided_slice %11 {offsets = [0, 112], sizes = [8, 16], strides = [1, 1]} : vector<8x128xf32> to vector<8x16xf32>
    %cst_19 = arith.constant dense<0.000000e+00> : vector<8xf32>
    %48 = vector.multi_reduction <add>, %47, %cst_19 [1] : vector<8x16xf32> to vector<8xf32>
    %49 = vector.shape_cast %48 : vector<8xf32> to vector<8x1xf32>
    %cst_20 = arith.constant 6.250000e-02 : f32
    %50 = vector.broadcast %cst_20 : f32 to vector<8x1xf32>
    %51 = arith.mulf %49, %50 : vector<8x1xf32>
    %52 = tpu.concatenate %16, %21, %26, %31, %36, %41, %46, %51 in 1 : vector<8x1xf32>, vector<8x1xf32>, vector<8x1xf32>, vector<8x1xf32>, vector<8x1xf32>, vector<8x1xf32>, vector<8x1xf32>, vector<8x1xf32> -> vector<8x8xf32>
    %c0_21 = arith.constant 0 : index
    %c0_22 = arith.constant 0 : index
    %53 = vector.load %arg3[%c0_21, %c0_22] : memref<8x8xf32, #tpu.memory_space<vmem>>, vector<8x8xf32>
    tpu.vector_store %arg3[%c0_21, %c0_22], %52 {strides = array<i32>} : memref<8x8xf32, #tpu.memory_space<vmem>>, vector<8x8xf32>,
    return
  }
  func.func @transform_0(%arg0: i32) -> (i32, i32) {
    %c0_i32 = arith.constant 0 : i32
    %c0_i32_0 = arith.constant 0 : i32
    return %arg0, %c0_i32 : i32, i32
  }
  func.func @transform_1(%arg0: i32) -> (i32, i32) {
    %c0_i32 = arith.constant 0 : i32
    %c0_i32_0 = arith.constant 0 : i32
    return %arg0, %c0_i32 : i32, i32
  }
  func.func @transform_2(%arg0: i32) -> (i32, i32) {
    %c0_i32 = arith.constant 0 : i32
    %c0_i32_0 = arith.constant 0 : i32
    return %arg0, %c0_i32 : i32, i32
  }
}

</mosaic_0001>

<bundles_post_ra>
// kernel: tpu_custom_call.1
= control target key start
LH: loop header
LB: loop body
LE: loop exit
PB: predicated region body
PF: predicated region fallthrough
CT: control target
= control target key end

     0   :  { %7 = vsyncpa [#allocation3], 0  ;;  %s711_s0 = inlined_call_operand.hbm [shape: f32[16,128], index: 0, kind: input, shape index: {}]   ;;  %s712_s1 = inlined_call_operand.hbm [shape: f32[16,128], index: 1, kind: input, shape index: {}]   ;;  %s713_s2 = inlined_call_operand.vmem [shape: f32[16,8], index: 2, kind: output, shape index: {}]  }
   0x1   :  { %9 = vsyncpa [#allocation3 + $0x1], 0 }
   0x2   :  { %10 = vsyncpa [#allocation5], 0 }
   0x3   :  { %12 = vsyncpa [#allocation5 + $0x1], 0  ;;  %s551_s9 = smov 0   ;;  %s553_s10 = smov 0  }
   0x4   :  { %s555_s11 = smov 0   ;;  %s557_s12 = smov 0  }
   0x5 LB: > { %s570_s13 = sadd.s32 4294967295, %s525_s12   ;;  %s573_s14 = sadd.s32 1, %s525_s12   ;;  %s525_s12 = sphi %s557_s12, %s725_s12   ;;  %s521_s11 = sphi %s555_s11, %s724_s11   ;;  %s517_s10 = sphi %s553_s10, %s723_s10   ;;  %s513_s9 = sphi %s551_s9, %s722_s9  }
   0x6   : > { %s22_s15 = ssub.s32 %s525_s12, %s573_s14  ;;  %s25_s16 = sadd.s32 1, %s521_s11 }
   0x7   : > { %p23_p0 = scmp.eq.s32.totalorder %s22_s15, 0  ;;  %p32_p1 = scmp.ne.s32.totalorder %s521_s11, %s517_s10 }
   0x8   : > { %p33_p2 = scmp.eq.s32.totalorder %s525_s12, 0  ;;  %p38_p3 = scmp.ne.s32.totalorder %s517_s10, %s513_s9 }
   0x9   : > { %s583_s17 = scalar_select %p23_p0, %s521_s11, %s25_s16  }
   0xa   : > { %p34_p4 = por %p33_p2, %p32_p1  ;;  %p39_p5 = scmp.eq.s32.totalorder %s570_s13, 0 }
   0xb   : > { %p389_p6 = scmp.lt.s32.totalorder %s525_s12, 2  ;;  %s592_s19 = sand.u32 1, %s521_s11  }
   0xc   : > { %p587_p7 = por %p39_p5, %p38_p3  ;;  %s368_s20 = sshll.u32 %s592_s19, 3 }
   0xd   : > { %s369_s21 = sshll.u32 %s525_s12, 7  ;;  %s118_s25 = scalar_lea.vmem [#allocation2], %s368_s20 }
   0xe   : > { %s715_s18 = scalar_select %p587_p7, 1, 0 }
   0xf   : > { %s601_s24 = scalar_lea.hbm %s711_s0, %s369_s21  ;;  %s125_s26 = sshll.u32 %s118_s25, 4  ;;  %s605_s26 = int_to_ptr.vmem [resolvable:$true] %s125_s26 }
  0x10   : > { %p607_p8 = pnand %p389_p6, %p34_p4  ;;  %s115_s28 = scalar_lea.sflag [#allocation3], %s592_s19 }
  0x11   : > { %s431_s29 = scalar_lea.hbm %s601_s24, 128  ;;  %s436_s4 = scalar_lea.hbm %s711_s0, 256 }
  0x12   : > { %p432_p11 = scmp.ne.s32.totalorder %s601_s24, %s431_s29  ;;  %p433_p12 = pneg %p607_p8 }
  0x13   : > { %p437_p1 = scmp.lt.s32.totalorder %s601_s24, %s711_s0  ;;  %p438_p2 = scmp.lt.s32.totalorder %s436_s4, %s431_s29 }
  0x14   : > { %p434_p13 = pnand %p433_p12, %p432_p11 }
  0x15   : > { %p439_p3 = por %p438_p2, %p437_p1 }
  0x16   : > { %p435_p0 = pneg %p434_p13 }
  0x18   : > { %p440_p4 = pnand %p439_p3, %p435_p0 }
  0x1a   : > { %443 = shalt.err (!%p440_p4)
}
  0x1b   : > { %s444_s7 = scalar_lea.vmem %s605_s26, 128  ;;  %s527_s8 = smov [#allocation2]  }
  0x1c   : > { %p445_p5 = scmp.ne.s32.totalorder %s605_s26, %s444_s7  ;;  %s449_s9 = sshll.u32 %s527_s8, 4  ;;  %s450_s9 = int_to_ptr.vmem [resolvable:$false] %s449_s9 }
  0x1d   : > { %s451_s15 = scalar_lea.vmem %s450_s9, 256  ;;  %p452_p13 = scmp.lt.s32.totalorder %s605_s26, %s450_s9 }
  0x1e   : > { %p447_p6 = pnand %p445_p5, %p433_p12  ;;  %p453_p9 = scmp.lt.s32.totalorder %s451_s15, %s444_s7 }
  0x20   : > { %p448_p11 = pneg %p447_p6  ;;  %p454_p10 = por %p453_p9, %p452_p13 }
  0x22   : > { %p455_p1 = pnand %p454_p10, %p448_p11 }
  0x24   : > { %458 = shalt.err (!%p455_p1)
}
  0x25   : > { %385 = dma.hbm_to_vmem [thread:$0]  (!%p607_p8), %s601_s24, 128, %s605_s26, %s115_s28  }
  0x26   : > { %p717_p0 = scmp.lt.s32.totalorder %s525_s12, 3  ;;  %p718_p2 = scmp.ge.s32.totalorder %s525_s12, 1 }
  0x27   : > { %s651_s25 = scalar_lea.hbm %s712_s1, %s369_s21  ;;  %s136_s29 = scalar_lea.vmem [#allocation4], %s368_s20 }
  0x28   : > { %p642_p3 = pnand %p718_p2, %p717_p0  ;;  %s143_s30 = sshll.u32 %s136_s29, 4  ;;  %s144_s30 = int_to_ptr.vmem [resolvable:$true] %s143_s30 }
  0x29   : > { %s133_s24 = scalar_lea.sflag [#allocation5], %s592_s19  ;;  %s459_s26 = scalar_lea.hbm %s651_s25, 128 }
  0x2a   : > { %s719_s16 = scalar_select %p642_p3, 1, 0 }
  0x2b   : > { %p460_p9 = scmp.ne.s32.totalorder %s651_s25, %s459_s26  ;;  %s464_s3 = scalar_lea.hbm %s712_s1, 256 }
  0x2c   : > { %p465_p5 = scmp.lt.s32.totalorder %s651_s25, %s712_s1  ;;  %p466_p6 = scmp.lt.s32.totalorder %s464_s3, %s459_s26 }
  0x2d   : > { %p462_p10 = pnand %p460_p9, %p433_p12 }
  0x2e   : > { %p467_p11 = por %p466_p6, %p465_p5 }
  0x2f   : > { %p463_p4 = pneg %p462_p10 }
  0x31   : > { %p468_p13 = pnand %p467_p11, %p463_p4 }
  0x33   : > { %471 = shalt.err (!%p468_p13)
}
  0x34   : > { %s472_s20 = scalar_lea.vmem %s144_s30, 128  ;;  %s528_s19 = smov [#allocation4]  }
  0x35   : > { %p473_p1 = scmp.ne.s32.totalorder %s144_s30, %s472_s20  ;;  %s477_s5 = sshll.u32 %s528_s19, 4  ;;  %s478_s5 = int_to_ptr.vmem [resolvable:$false] %s477_s5 }
  0x36   : > { %s479_s6 = scalar_lea.vmem %s478_s5, 256  ;;  %p480_p9 = scmp.lt.s32.totalorder %s144_s30, %s478_s5 }
  0x37   : > { %p475_p0 = pnand %p473_p1, %p433_p12  ;;  %p481_p10 = scmp.lt.s32.totalorder %s479_s6, %s472_s20 }
  0x39   : > { %p476_p2 = pneg %p475_p0  ;;  %p482_p7 = por %p481_p10, %p480_p9 }
  0x3b   : > { %p483_p3 = pnand %p482_p7, %p476_p2 }
  0x3d   : > { %486 = shalt.err (!%p483_p3)
}
  0x3e   : > { %388 = dma.hbm_to_vmem [thread:$0]  (!%p607_p8), %s651_s25, 128, %s144_s30, %s133_s24  }
  0x3f   : > { %p720_p4 = scmp.ne.s32.totalorder %s719_s16, 0 }
  0x40   : > { %s154_s7 = sand.u32 (!%p720_p4), 1, %s517_s10   ;;  %p721_p12 = scmp.ne.s32.totalorder (!%p720_p4), %s715_s18, 0 }
  0x41   : > { %152 = sbr.rel (%p720_p4) target bundleno = 426 (0x1aa), region = 28  ;;  %s373_s8 = sshll.u32 (!%p720_p4), %s154_s7, 3 }
  0x42   : > { %s155_s9 = scalar_lea.sflag (!%p720_p4), [#allocation3], %s154_s7  ;;  %s158_s15 = scalar_lea.vmem (!%p720_p4), [#allocation2], %s373_s8 }
  0x46   : > { %504 = dma.done.wait (%p721_p12), %s155_s9, 128  }
  0x47   : > { %506 = vsyncadd (%p721_p12), %s155_s9, 4294967168  ;;  %s164_s22 = scalar_lea.sflag [#allocation5], %s154_s7  ;;  %s167_s23 = scalar_lea.vmem [#allocation4], %s373_s8 }
  0x48   : > { %508 = dma.done.wait (%p721_p12), %s164_s22, 128  }
  0x49   : > { %510 = vsyncadd (%p721_p12), %s164_s22, 4294967168  ;;  %v196_v0 = vld [vmem:[%s158_s15] sm:$0xff]  ;;  %v197_v5 = vld [vmem:[%s167_s23] sm:$0xff]  ;;  %s529_s27 = smov 112   ;;  %s530_s16 = smov 96   ;;  %vm206_vm0 = vcmask 130048  }
  0x4a   : > { %v202_v1 = vadd.f32 1e-06, %v196_v0  ;;  %v198_v2 = vsub.f32 1.0, %v196_v0  ;;  %s531_s25 = smov 80   ;;  %s532_s18 = smov 64   ;;  %vm261_vm1 = vcmask 7168  }
  0x4b   : > { %s533_s29 = smov 48   ;;  %s534_s30 = smov 32   ;;  %vm263_vm2 = vcmask 15360   ;;  %vm265_vm3 = vcmask 23552   ;;  %vm267_vm4 = vcmask 31744   ;;  %vm269_vm5 = vcmask 39936  }
  0x4c   : > { %429 = vlog2.f32 %v202_v1  ;;  %v199_v3 = vmul.f32 %v198_v2, %v198_v2  ;;  %s535_s24 = smov 16   ;;  %p192_p7 = scmp.lt.s32.totalorder %s570_s13, 1  ;;  %vm271_vm6 = vcmask 48128   ;;  %vm273_vm7 = vcmask 56320  }
  0x4d   : > { %vm275_vm8 = vcmask 64512  }
  0x4e   : > { %v200_v4 = vmul.f32 -1.0, %v199_v3  ;;  %s727_s13 = smov (!%p192_p7, %s570_s13), 1 }
  0x4f   : > { %s375_s26 = sshll.u32 %s727_s13, 3 }
  0x50   : > { %v201_v6 = vmul.f32 %v200_v4, %v197_v5  ;;  %s195_s3 = scalar_lea.vmem %s713_s2, %s375_s26 }
  0x59   : > { %v430_v7 = vpop.eup %429 }
  0x5a   : > { %v204_v8 = vmul.f32 0.6931472, %v430_v7 }
  0x5c   : > { %v205_v9 = vmul.f32 %v204_v8, %v201_v6 }
  0x5e   : > { %212 = vrot.lane.b32.xlu0 %v205_v9, %s529_s27  ;;  %219 = vrot.lane.b32.xlu1 %v205_v9, %s530_s16  ;;  %v207_v10 = vsel %vm206_vm0, %v205_v9, 0.0 }
  0x62   : > { %226 = vrot.lane.b32.xlu0 %v205_v9, %s531_s25 }
  0x81   : > { %208 = vadd.xlane.f32.xlu0 %v207_v10 }
  0x97   : > { %233 = vrot.lane.b32.xlu0 %v205_v9, %s532_s18 }
  0x9b   : > { %240 = vrot.lane.b32.xlu0 %v205_v9, %s533_s29 }
  0x9f   : > { %247 = vrot.lane.b32.xlu0 %v205_v9, %s534_s30 }
  0xa3   : > { %254 = vrot.lane.b32.xlu0 %v205_v9, %s535_s24 }
  0xd0   : > { %v213_v11 = vpop.permute.xlu0 %212  ;;  %v220_v12 = vpop.permute.xlu1 %219 }
  0xd1   : > { %v215_v13 = vsel %vm206_vm0, %v213_v11, 0.0  ;;  %v222_v14 = vsel %vm206_vm0, %v220_v12, 0.0 }
  0xd2   : > { %216 = vadd.xlane.f32.xlu1 %v215_v13 }
  0xd4   : > { %v227_v15 = vpop.permute.xlu0 %226 }
  0xd5   : > { %v229_v16 = vsel %vm206_vm0, %v227_v15, 0.0 }
  0xd6   : > { %223 = vadd.xlane.f32.xlu1 %v222_v14  ;;  %230 = vadd.xlane.f32.xlu0 %v229_v16 }
 0x10a   : > { %v209_v17 = vpop.xlane.xlu0 %208 }
 0x10b   : > { %v210_v33 = vmul.f32 0.0625, %v209_v17 }
 0x10e   : > { %v234_v18 = vpop.permute.xlu0 %233 }
 0x10f   : > { %v236_v19 = vsel %vm206_vm0, %v234_v18, 0.0 }
 0x110   : > { %237 = vadd.xlane.f32.xlu1 %v236_v19 }
 0x112   : > { %v241_v20 = vpop.permute.xlu0 %240 }
 0x113   : > { %v243_v21 = vsel %vm206_vm0, %v241_v20, 0.0 }
 0x114   : > { %244 = vadd.xlane.f32.xlu1 %v243_v21 }
 0x116   : > { %v248_v22 = vpop.permute.xlu0 %247 }
 0x117   : > { %v250_v23 = vsel %vm206_vm0, %v248_v22, 0.0 }
 0x118   : > { %251 = vadd.xlane.f32.xlu1 %v250_v23 }
 0x11a   : > { %v255_v24 = vpop.permute.xlu0 %254 }
 0x11b   : > { %v257_v25 = vsel %vm206_vm0, %v255_v24, 0.0 }
 0x11c   : > { %258 = vadd.xlane.f32.xlu1 %v257_v25 }
 0x15b   : > { %v217_v26 = vpop.xlane.xlu1 %216 }
 0x15c   : > { %v218_v29 = vmul.f32 0.0625, %v217_v26 }
 0x15e   : > { %v262_v34 = vsel %vm261_vm1, %v210_v33, %v218_v29 }
 0x15f   : > { %v224_v27 = vpop.xlane.xlu1 %223  ;;  %v231_v31 = vpop.xlane.xlu0 %230 }
 0x160   : > { %v225_v30 = vmul.f32 0.0625, %v224_v27  ;;  %v232_v35 = vmul.f32 0.0625, %v231_v31 }
 0x162   : > { %v264_v36 = vsel %vm263_vm2, %v262_v34, %v225_v30 }
 0x163   : > { %v266_v41 = vsel %vm265_vm3, %v264_v36, %v232_v35 }
 0x199   : > { %v238_v28 = vpop.xlane.xlu1 %237 }
 0x19a   : > { %v239_v37 = vmul.f32 0.0625, %v238_v28 }
 0x19c   : > { %v268_v42 = vsel %vm267_vm4, %v266_v41, %v239_v37 }
 0x19d   : > { %v245_v32 = vpop.xlane.xlu1 %244 }
 0x19e   : > { %v246_v39 = vmul.f32 0.0625, %v245_v32 }
 0x1a0   : > { %v270_v44 = vsel %vm269_vm5, %v268_v42, %v246_v39 }
 0x1a1   : > { %v252_v38 = vpop.xlane.xlu1 %251 }
 0x1a2   : > { %v253_v40 = vmul.f32 0.0625, %v252_v38 }
 0x1a4   : > { %v272_v46 = vsel %vm271_vm6, %v270_v44, %v253_v40 }
 0x1a5   : > { %v259_v43 = vpop.xlane.xlu1 %258 }
 0x1a6   : > { %v260_v45 = vmul.f32 0.0625, %v259_v43 }
 0x1a8   : > { %v274_v47 = vsel %vm273_vm7, %v272_v46, %v260_v45 }
 0x1a9   : > { %276 = vst.msk [vmem:[%s195_s3] sm:$0xff] %vm275_vm8, %v274_v47 }
 0x1aa PF: > { %p15_p8 = scmp.ge.s32.totalorder %s573_s14, 4   ;;  %s722_s9 = smov %s517_s10 }
 0x1ab   : > { %s723_s10 = smov %s521_s11  ;;  %s724_s11 = smov %s583_s17 }
 0x1ac   : > { %s725_s12 = smov %s573_s14  ;;  %17 = sbr.rel (!%p15_p8) target bundleno = 5 (0x5), region = 81 }
 0x1b1   :  { %296 = vsyncpa [#allocation3], 1 }
 0x1b2   :  { %298 = vsyncpa [#allocation3 + $0x1], 1 }
 0x1b3   :  { %299 = vsyncpa [#allocation5], 1 }
 0x1b4   :  { %301 = vsyncpa [#allocation5 + $0x1], 1 }

</bundles_post_ra>
